<compile_context>
chip_gen: v6e
topology: v6e:2x2x1
jax: 0.10.0
libtpu: 0.0.40
codegen_flags: <defaults>
</compile_context>

<pallas_src>
import functools

import jax
import jax.numpy as jnp
from jax.experimental import pallas as pl
from jax.experimental.pallas import tpu as pltpu


def _round_up(x, m):
    return ((x + m - 1) // m) * m


def _kg_name_linear_kernel(x_ref, w_ref, b_ref, o_ref):
    # x_ref: (tm, Kp) bf16   w_ref: (Kp, Dblk) bf16   b_ref: (1, Dblk) f32
    # o_ref: (tm, Dblk) f32
    acc = jnp.dot(x_ref[...], w_ref[...], preferred_element_type=jnp.float32)
    o_ref[...] = (acc + b_ref[...]).astype(o_ref.dtype)


@functools.partial(jax.jit, static_argnames=("tm", "tn", "x_buffers"))
def kg_name_linear_padded(x_pad, w_pad, b_pad, *, tm=1024, tn=256,
                          x_buffers=2):
    """Computes x_pad @ w_pad + b_pad with a tiled Pallas matmul.

    x_pad: [N, Kp]   (Kp multiple of 128; bf16 or f32)
    w_pad: [Kp, Dp]  (pre-transposed Linear weight; bf16 or f32)
    b_pad: [1, Dp]   (f32)
    Returns [N, Dp] float32.
    """
    N, Kp = x_pad.shape
    Kp2, Dp = w_pad.shape
    assert Kp == Kp2 and b_pad.shape == (1, Dp)

    n_rows = _round_up(N, 8)
    tm_eff = min(tm, n_rows)
    # v7x has 2 TensorCores sharded over "parallel" grid axes: if the row axis
    # would collapse to a single step, split it in two (only when the halves
    # are still >= 128 rows) so both cores get work.
    if tm_eff == n_rows:
        half = _round_up((n_rows + 1) // 2, 8)
        if half >= 128:
            tm_eff = half

    x_bytes = jnp.dtype(x_pad.dtype).itemsize
    w_bytes = jnp.dtype(w_pad.dtype).itemsize

    def x_spec(index_map):
        if x_buffers > 2:
            return pl.BlockSpec((tm_eff, Kp), index_map,
                                pipeline_mode=pl.Buffered(x_buffers))
        return pl.BlockSpec((tm_eff, Kp), index_map)

    if Dp <= 512:
        # W + bias fully VMEM-resident (constant block index -> no re-DMA),
        # single exact-width output slab, 1-D grid over rows only.
        tn_eff = Dp
        grid = (pl.cdiv(N, tm_eff),)
        in_specs = [
            x_spec(lambda i: (i, 0)),                 # streamed row tile of x
            pl.BlockSpec((Kp, Dp), lambda i: (0, 0)),  # resident W^T
            pl.BlockSpec((1, Dp), lambda i: (0, 0)),   # resident bias
        ]
        out_specs = pl.BlockSpec((tm_eff, Dp), lambda i: (i, 0))
        semantics = ("parallel",)
    else:
        # Large e_dim: tile the (padded, 256-aligned) output dim as well.
        tn_eff = min(tn, Dp)
        grid = (pl.cdiv(N, tm_eff), pl.cdiv(Dp, tn_eff))
        in_specs = [
            x_spec(lambda i, j: (i, 0)),
            pl.BlockSpec((Kp, tn_eff), lambda i, j: (0, j)),
            pl.BlockSpec((1, tn_eff), lambda i, j: (0, j)),
        ]
        out_specs = pl.BlockSpec((tm_eff, tn_eff), lambda i, j: (i, j))
        semantics = ("parallel", "parallel")

    # Explicit VMEM budget: x_buffers x-tiles + (up to) double-buffered
    # W / bias / output tiles, with margin; capped at v7x physical VMEM.
    vmem_bytes = (max(x_buffers, 2) * tm_eff * Kp * x_bytes
                  + 2 * Kp * tn_eff * w_bytes
                  + 2 * tn_eff * 4
                  + 2 * tm_eff * tn_eff * 4)
    vmem_limit = max(int(vmem_bytes * 2) + (4 << 20), 32 * 1024 * 1024)
    vmem_limit = min(vmem_limit, 64 * 1024 * 1024)

    return pl.pallas_call(
        _kg_name_linear_kernel,
        out_shape=jax.ShapeDtypeStruct((N, Dp), jnp.float32),  # f32 pinned
        grid_spec=pltpu.PrefetchScalarGridSpec(
            num_scalar_prefetch=0,
            grid=grid,
            in_specs=in_specs,
            out_specs=out_specs,
        ),
        compiler_params=pltpu.CompilerParams(
            dimension_semantics=semantics,
            vmem_limit_bytes=vmem_limit,
        ),
    )(x_pad, w_pad, b_pad)


class AlignHtransPallas:
    """Minimal JAX/Pallas re-implementation of Align_Htrans.forward()'s
    implementable portion (the kg_name_model Linear projection)."""

    K_PAD_TO = 128       # pad contraction dim 300 -> 384
    D_TILE_SPLIT = 512   # above this width, tile the output dim
    D_PAD_TO = 256       # pad granularity when the output dim is tiled

    def __init__(self, kg_E=64, e_dim=32, name_dim=300, key=None,
                 tm=1024, tn=256, compute_dtype=jnp.bfloat16):
        if key is None:
            key = jax.random.PRNGKey(0)
        k_embed, k_w, k_b = jax.random.split(key, 3)

        self.kg_E = kg_E
        self.e_dim = e_dim
        self.name_dim = name_dim
        self.tm = tm
        self.tn = tn
        self.compute_dtype = compute_dtype

        # Deterministic synthetic "ename_embed" table [kg_E, 300]
        self.kg_name_embed = jax.random.normal(
            k_embed, (kg_E, name_dim), jnp.float32)
        # nn.Linear(300, e_dim) default-style init, deterministic
        bound = 1.0 / jnp.sqrt(name_dim)
        self.weight = jax.random.uniform(k_w, (e_dim, name_dim), jnp.float32,
                                         minval=-bound, maxval=bound)
        self.bias = jax.random.uniform(k_b, (e_dim,), jnp.float32,
                                       minval=-bound, maxval=bound)

        # ---- one-time layout prep (hoisted out of forward) --------------
        Kp = _round_up(name_dim, self.K_PAD_TO)          # 300 -> 384
        if e_dim <= self.D_TILE_SPLIT:
            Dp = e_dim                                   # exact width output
        else:
            Dp = _round_up(e_dim, self.D_PAD_TO)         # 256-aligned tiles
        self.Kp, self.Dp = Kp, Dp

        # x padded on the contraction (lane) dim and cast to bf16: [kg_E, Kp]
        self.x_pad = jnp.pad(
            self.kg_name_embed, ((0, 0), (0, Kp - name_dim))
        ).astype(compute_dtype)
        # weight transposed + zero-padded + cast to bf16: [Kp, Dp]
        w_t = jnp.transpose(self.weight)                 # (300, e_dim)
        self.w_pad = jnp.pad(
            w_t, ((0, Kp - name_dim), (0, Dp - e_dim))
        ).astype(compute_dtype)
        # bias as a dense f32 row: [1, Dp]
        self.b_pad = jnp.pad(self.bias.reshape(1, e_dim),
                             ((0, 0), (0, Dp - e_dim)))

    def forward(self):
        out = kg_name_linear_padded(self.x_pad, self.w_pad, self.b_pad,
                                    tm=self.tm, tn=self.tn)
        if self.Dp != self.e_dim:
            out = out[:, :self.e_dim]
        end_embed_in = out
        # TODO(synk): self.model_rels(...) (Multi_Htrans_Layer) unavailable;
        # its rel_embed / skip_w outputs are not produced here.
        return end_embed_in


if __name__ == "__main__":
    model = AlignHtransPallas(kg_E=64, e_dim=32, name_dim=300,
                              key=jax.random.PRNGKey(0))
    out = model.forward()
    out = jax.block_until_ready(out)

    # Reference: same bf16-rounded inputs, exact f32 math (Linear: x @ W.T + b)
    xq = model.kg_name_embed.astype(model.compute_dtype).astype(jnp.float32)
    wq = model.weight.astype(model.compute_dtype).astype(jnp.float32)
    ref = jnp.dot(xq, wq.T, precision=jax.lax.Precision.HIGHEST) + model.bias

    assert out.shape == (64, 32)
    assert out.dtype == jnp.float32
    assert jnp.allclose(out, ref, atol=2e-2, rtol=2e-2)

    print("KERNEL_OK")
</pallas_src>

<mosaic_0001>
module attributes {stable_mosaic.version = 11 : i64} {
  func.func @_kg_name_linear_kernel(%arg0: i32, %arg1: memref<64x384xbf16, #tpu.memory_space<vmem>>, %arg2: memref<384x32xbf16, #tpu.memory_space<vmem>>, %arg3: memref<1x32xf32, #tpu.memory_space<vmem>>, %arg4: memref<64x32xf32, #tpu.memory_space<vmem>>) attributes {dimension_semantics = [#tpu.dimension_semantics<parallel>], iteration_bounds = array<i64: 1>, scalar_prefetch = 0 : i64, scratch_operands = 0 : i64, tpu.core_type = #tpu.core_type<tc>, window_params = [{transform_indices = @transform_0, window_bounds = array<i64: 64, 384>}, {pipeline_mode = #tpu.pipeline_mode<synchronous>, transform_indices = @transform_1, window_bounds = array<i64: 384, 32>}, {pipeline_mode = #tpu.pipeline_mode<synchronous>, transform_indices = @transform_2, window_bounds = array<i64: 1, 32>}, {transform_indices = @transform_3, window_bounds = array<i64: 64, 32>}]} {
    %c0 = arith.constant 0 : index
    %c0_0 = arith.constant 0 : index
    %0 = vector.load %arg1[%c0, %c0_0] : memref<64x384xbf16, #tpu.memory_space<vmem>>, vector<64x384xbf16>
    %c0_1 = arith.constant 0 : index
    %c0_2 = arith.constant 0 : index
    %1 = vector.load %arg2[%c0_1, %c0_2] : memref<384x32xbf16, #tpu.memory_space<vmem>>, vector<384x32xbf16>
    %cst = arith.constant dense<0.000000e+00> : vector<64x32xf32>
    %2 = tpu.matmul %0, %1, %cst {dimension_numbers = #tpu.dot_dimension_numbers<[1], [0], [0], [1], [0, 0, 1, 1], [], []>} : vector<64x384xbf16>, vector<384x32xbf16>, vector<64x32xf32> -> vector<64x32xf32>
    %c0_3 = arith.constant 0 : index
    %c0_4 = arith.constant 0 : index
    %3 = vector.load %arg3[%c0_3, %c0_4] : memref<1x32xf32, #tpu.memory_space<vmem>>, vector<1x32xf32>
    %4 = vector.broadcast %3 : vector<1x32xf32> to vector<64x32xf32>
    %5 = arith.addf %2, %4 : vector<64x32xf32>
    %c0_5 = arith.constant 0 : index
    %c0_6 = arith.constant 0 : index
    %6 = vector.load %arg4[%c0_5, %c0_6] : memref<64x32xf32, #tpu.memory_space<vmem>>, vector<64x32xf32>
    tpu.vector_store %arg4[%c0_5, %c0_6], %5 {strides = array<i32>} : memref<64x32xf32, #tpu.memory_space<vmem>>, vector<64x32xf32>,
    return
  }
  func.func @transform_0(%arg0: i32) -> (i32, i32) {
    %c0_i32 = arith.constant 0 : i32
    %c0_i32_0 = arith.constant 0 : i32
    return %arg0, %c0_i32 : i32, i32
  }
  func.func @transform_1(%arg0: i32) -> (i32, i32) {
    %c0_i32 = arith.constant 0 : i32
    %c0_i32_0 = arith.constant 0 : i32
    %c0_i32_1 = arith.constant 0 : i32
    return %c0_i32, %c0_i32_0 : i32, i32
  }
  func.func @transform_2(%arg0: i32) -> (i32, i32) {
    %c0_i32 = arith.constant 0 : i32
    %c0_i32_0 = arith.constant 0 : i32
    %c0_i32_1 = arith.constant 0 : i32
    return %c0_i32, %c0_i32_0 : i32, i32
  }
  func.func @transform_3(%arg0: i32) -> (i32, i32) {
    %c0_i32 = arith.constant 0 : i32
    %c0_i32_0 = arith.constant 0 : i32
    return %arg0, %c0_i32 : i32, i32
  }
}

</mosaic_0001>

<bundles_post_ra>
// kernel: kg_name_linear_padded.1
= control target key start
LH: loop header
LB: loop body
LE: loop exit
PB: predicated region body
PF: predicated region fallthrough
CT: control target
= control target key end

     0   :  { %vm424_vm0 = vcmask 261120   ;;  %s753_s1 = inlined_call_operand.vmem [shape: bf16[384,32], index: 1, kind: input, shape index: {}]   ;;  %s754_s0 = inlined_call_operand.vmem [shape: bf16[64,384], index: 0, kind: input, shape index: {}]   ;;  %s755_s2 = inlined_call_operand.vmem [shape: f32[1,32], index: 2, kind: input, shape index: {}]   ;;  %s756_s3 = inlined_call_operand.vmem [shape: f32[64,32], index: 3, kind: output, shape index: {}]  }
   0x1   :  { %v550_v0 = vld [vmem:[%s753_s1 + $0x78] sm:$0xff]   ;;  %v552_v2 = vld [vmem:[%s753_s1 + $0x70] sm:$0xff]   ;;  %v555_v5 = vld [vmem:[%s753_s1 + $0x68] sm:$0xff]  }
   0x2   :  { %v551_v1 = vld [vmem:[%s753_s1 + $0x38] sm:$0xff]   ;;  %474 = vmatprep.subr.bf16.mxu0 %v550_v0  ;;  %v554_v4 = vld [vmem:[%s753_s1 + $0x30] sm:$0xff]   ;;  %v557_v7 = vld [vmem:[%s753_s1 + $0x28] sm:$0xff]  }
   0x3   :  { %475 = vmatpush3.bf16.msra.mxu0 %v551_v1  ;;  %v553_v3 = vld [vmem:[%s753_s1 + $0xb8] sm:$0xff]   ;;  %v556_v6 = vld [vmem:[%s753_s1 + $0xb0] sm:$0xff]   ;;  %v558_v8 = vld [vmem:[%s753_s1 + $0x60] sm:$0xff]  }
   0x4   :  { %476 = vmatprep.subr.bf16.mxu0 %v552_v2  ;;  %526 = vmatprep.subr.bf16.mxu1 %v553_v3  ;;  %v559_v9 = vld [vmem:[%s753_s1 + $0xa8] sm:$0xff]   ;;  %v560_v10 = vld [vmem:[%s753_s1 + $0x20] sm:$0xff]   ;;  %v561_v11 = vld [vmem:[%s753_s1 + $0x58] sm:$0xff]  }
   0x5   :  { %527 = vmatpush3.bf16.msra.mxu1 %v553_v3  ;;  %v562_v12 = vld [vmem:[%s753_s1 + $0xa0] sm:$0xff]   ;;  %v563_v13 = vld [vmem:[%s753_s1 + $0x18] sm:$0xff]   ;;  %v564_v15 = vld [vmem:[%s753_s1 + $0x50] sm:$0xff]  }
   0x6   :  { %528 = vmatprep.subr.bf16.mxu1 %v556_v6  ;;  %v565_v14 = vld [vmem:[%s753_s1 + $0x98] sm:$0xff]   ;;  %v566_v16 = vld [vmem:[%s753_s1 + $0x10] sm:$0xff]   ;;  %v567_v18 = vld [vmem:[%s753_s1 + $0x48] sm:$0xff]  }
   0x7   :  { %477 = vmatpush3.bf16.msra.mxu0 %v554_v4  ;;  %v568_v17 = vld [vmem:[%s753_s1 + $0x90] sm:$0xff]   ;;  %v569_v19 = vld [vmem:[%s753_s1 + $0x8] sm:$0xff]   ;;  %v570_v20 = vld [vmem:[%s753_s1 + $0x40] sm:$0xff]  }
   0x8   :  { %478 = vmatprep.subr.bf16.mxu0 %v555_v5  ;;  %v571_v21 = vld [vmem:[%s753_s1 + $0x88] sm:$0xff]   ;;  %v575_v22 = vld [vmem:[%s754_s0 + $0x4] ss:$12 sps:$4 sm:$0xff]   ;;  %v582_v31 = vld [vmem:[%s754_s0 + $0x34] ss:$12 sps:$4 sm:$0xff]  }
   0x9   :  { %529 = vmatpush3.bf16.msra.mxu1 %v556_v6  ;;  %v572_v23 = vld [vmem:[%s753_s1] sm:$0xff]   ;;  %326 = vmatprep.mubr.bf16.mxu0 %v575_v22  ;;  %v577_v24 = vld [vmem:[%s754_s0 + $0x8] ss:$12 sps:$4 sm:$0xff]   ;;  %v586_v32 = vld [vmem:[%s754_s0 + $0x50] ss:$12 sps:$4 sm:$0xff]  }
   0xa   :  { %530 = vmatprep.subr.bf16.mxu1 %v559_v9  ;;  %v576_v25 = vld [vmem:[%s753_s1 + $0x80] sm:$0xff]   ;;  %542 = vmatprep.mubr.bf16.mxu1 %v577_v24  ;;  %v579_v27 = vld [vmem:[%s754_s0 + $0x1c] ss:$12 sps:$4 sm:$0xff]   ;;  %v587_v34 = vld [vmem:[%s754_s0 + $0x4c] ss:$12 sps:$4 sm:$0xff]  }
   0xb   :  { %479 = vmatpush3.bf16.msra.mxu0 %v557_v7  ;;  %v573_v26 = vld [vmem:[%s754_s0] ss:$12 sps:$4 sm:$0xff]   ;;  %v585_v29 = vld [vmem:[%s754_s0 + $0x38] ss:$12 sps:$4 sm:$0xff]   ;;  %v584_v33 = vld [vmem:[%s754_s0 + $0x30] ss:$12 sps:$4 sm:$0xff]  }
   0xc   :  { %480 = vmatprep.subr.bf16.mxu0 %v558_v8  ;;  %v578_v28 = vld [vmem:[%s754_s0 + $0x20] ss:$12 sps:$4 sm:$0xff]   ;;  %v581_v30 = vld [vmem:[%s754_s0 + $0x18] ss:$12 sps:$4 sm:$0xff]   ;;  %v589_v35 = vld [vmem:[%s754_s0 + $0x48] ss:$12 sps:$4 sm:$0xff]  }
   0xd   :  { %531 = vmatpush3.bf16.msra.mxu1 %v559_v9  ;;  %v437_v38 = vld [vmem:[%s755_s2] ss:$0 sm:$0xff] }
   0xe   :  { %532 = vmatprep.subr.bf16.mxu1 %v562_v12 }
   0xf   :  { %481 = vmatpush3.bf16.msra.mxu0 %v560_v10 }
  0x10   :  { %482 = vmatprep.subr.bf16.mxu0 %v561_v11 }
  0x11   :  { %533 = vmatpush3.bf16.msra.mxu1 %v562_v12 }
  0x12   :  { %534 = vmatprep.subr.bf16.mxu1 %v565_v14 }
  0x13   :  { %483 = vmatpush3.bf16.msra.mxu0 %v563_v13 }
  0x14   :  { %484 = vmatprep.subr.bf16.mxu0 %v564_v15 }
  0x15   :  { %535 = vmatpush3.bf16.msra.mxu1 %v565_v14 }
  0x16   :  { %536 = vmatprep.subr.bf16.mxu1 %v568_v17 }
  0x17   :  { %485 = vmatpush3.bf16.msra.mxu0 %v566_v16 }
  0x18   :  { %486 = vmatprep.subr.bf16.mxu0 %v567_v18 }
  0x19   :  { %537 = vmatpush3.bf16.msra.mxu1 %v568_v17 }
  0x1a   :  { %538 = vmatprep.subr.bf16.mxu1 %v571_v21 }
  0x1b   :  { %487 = vmatpush3.bf16.msra.mxu0 %v569_v19 }
  0x1c   :  { %488 = vmatprep.subr.bf16.mxu0 %v570_v20 }
  0x1d   :  { %539 = vmatpush3.bf16.msra.mxu1 %v571_v21 }
  0x1e   :  { %540 = vmatprep.subr.bf16.mxu1 %v576_v25 }
  0x1f   :  { %489 = vmatpush3.bf16.msra.mxu0 %v572_v23 }
  0x21   :  { %541 = vmatpush3.bf16.msra.mxu1 %v576_v25 }
  0x22   :  { %327 = vmatmul.mubr.bf16.vlgmr.msra.gmra.mxu0 %v573_v26 }
  0x23   :  { %334 = vmatprep.mubr.bf16.mxu0 %v579_v27 }
  0x24   :  { %543 = vmatmul.mubr.bf16.vlgmr.msra.gmra.mxu1 %v578_v28 }
  0x25   :  { %546 = vmatprep.mubr.bf16.mxu1 %v585_v29 }
  0x2a   :  { %335 = vmatmul.mubr.bf16.gmra.mxu0 %v581_v30 }
  0x2b   :  { %342 = vmatprep.mubr.bf16.mxu0 %v582_v31 }
  0x2c   :  { %547 = vmatmul.mubr.bf16.gmra.mxu1 %v586_v32 }
  0x32   :  { %343 = vmatmul.mubr.bf16.gmra.mxu0 %v584_v33 }
  0x33   :  { %350 = vmatprep.mubr.bf16.mxu0 %v587_v34 }
  0x3a   :  { %351 = vmatmul.mubr.bf16.gmra.mxu0 %v589_v35 }
  0xe2   :  { %v490_v36 = vpop.f32.mrf.mxu0 }
  0xe4   :  { %v491_v37 = vpop.f32.mrf.mxu0  ;;  %v544_v40 = vpop.f32.mrf.mxu1 }
  0xe5   :  { %v492_v39 = vadd.f32 %v491_v37, %v490_v36 }
  0xe6   :  { %v493_v41 = vpop.f32.mrf.mxu0  ;;  %v393_v43 = vpop.f32.mrf.mxu1 }
  0xe7   :  { %v329_v42 = vadd.f32 %v492_v39, %v437_v38 }
  0xe8   :  { %v494_v44 = vpop.f32.mrf.mxu0  ;;  %v545_v47 = vpop.f32.mrf.mxu1 }
  0xe9   :  { %v495_v45 = vadd.f32 %v494_v44, %v493_v41  ;;  %v394_v46 = vadd.f32 %v393_v43, %v329_v42 }
  0xea   :  { %v496_v48 = vpop.f32.mrf.mxu0  ;;  %v396_v50 = vpop.f32.mrf.mxu1 }
  0xeb   :  { %425 = vst.msk [vmem:[%s756_s3] sm:$0xff] %vm424_vm0, %v394_v46  ;;  %v332_v49 = vadd.f32 %v495_v45, %v437_v38 }
  0xec   :  { %v497_v51 = vpop.f32.mrf.mxu0  ;;  %v548_v55 = vpop.f32.mrf.mxu1 }
  0xed   :  { %v498_v52 = vadd.f32 %v497_v51, %v496_v48  ;;  %v397_v53 = vadd.f32 %v396_v50, %v332_v49 }
  0xee   :  { %v499_v54 = vpop.f32.mrf.mxu0  ;;  %v409_v61 = vpop.f32.mrf.mxu1 }
  0xef   :  { %v337_v56 = vadd.f32 %v498_v52, %v437_v38  ;;  %426 = vst.msk [vmem:[%s756_s3 + $0x8] sm:$0xff] %vm424_vm0, %v397_v53 }
  0xf0   :  { %v500_v57 = vpop.f32.mrf.mxu0  ;;  %v549_v3 = vpop.f32.mrf.mxu1 }
  0xf1   :  { %v402_v58 = vadd.f32 %v544_v40, %v337_v56  ;;  %v501_v59 = vadd.f32 %v500_v57, %v499_v54 }
  0xf2   :  { %v502_v60 = vpop.f32.mrf.mxu0  ;;  %v412_v9 = vpop.f32.mrf.mxu1 }
  0xf3   :  { %427 = vst.msk [vmem:[%s756_s3 + $0x10] sm:$0xff] %vm424_vm0, %v402_v58  ;;  %v340_v62 = vadd.f32 %v501_v59, %v437_v38 }
  0xf4   :  { %v503_v63 = vpop.f32.mrf.mxu0 }
  0xf5   :  { %v405_v0 = vadd.f32 %v545_v47, %v340_v62  ;;  %v504_v1 = vadd.f32 %v503_v63, %v502_v60 }
  0xf6   :  { %v505_v2 = vpop.f32.mrf.mxu0 }
  0xf7   :  { %428 = vst.msk [vmem:[%s756_s3 + $0x18] sm:$0xff] %vm424_vm0, %v405_v0  ;;  %v345_v4 = vadd.f32 %v504_v1, %v437_v38 }
  0xf8   :  { %v506_v5 = vpop.f32.mrf.mxu0 }
  0xf9   :  { %v507_v6 = vadd.f32 %v506_v5, %v505_v2  ;;  %v410_v7 = vadd.f32 %v409_v61, %v345_v4 }
  0xfa   :  { %v508_v8 = vpop.f32.mrf.mxu0 }
  0xfb   :  { %429 = vst.msk [vmem:[%s756_s3 + $0x20] sm:$0xff] %vm424_vm0, %v410_v7  ;;  %v348_v10 = vadd.f32 %v507_v6, %v437_v38 }
  0xfc   :  { %v509_v11 = vpop.f32.mrf.mxu0 }
  0xfd   :  { %v510_v12 = vadd.f32 %v509_v11, %v508_v8  ;;  %v413_v13 = vadd.f32 %v412_v9, %v348_v10 }
  0xfe   :  { %v511_v14 = vpop.f32.mrf.mxu0 }
  0xff   :  { %v353_v15 = vadd.f32 %v510_v12, %v437_v38  ;;  %430 = vst.msk [vmem:[%s756_s3 + $0x28] sm:$0xff] %vm424_vm0, %v413_v13 }
 0x100   :  { %v512_v16 = vpop.f32.mrf.mxu0 }
 0x101   :  { %v418_v17 = vadd.f32 %v548_v55, %v353_v15  ;;  %v513_v18 = vadd.f32 %v512_v16, %v511_v14 }
 0x103   :  { %431 = vst.msk [vmem:[%s756_s3 + $0x30] sm:$0xff] %vm424_vm0, %v418_v17  ;;  %v356_v19 = vadd.f32 %v513_v18, %v437_v38 }
 0x105   :  { %v421_v20 = vadd.f32 %v549_v3, %v356_v19 }
 0x107   :  { %432 = vst.msk [vmem:[%s756_s3 + $0x38] sm:$0xff] %vm424_vm0, %v421_v20 }

</bundles_post_ra>
